<compile_context>
chip_gen: v7x
topology: tpu7x:2x2x1
jax: 0.10.0
libtpu: 0.0.40
codegen_flags: <defaults>
</compile_context>

<pallas_src>
import jax
import jax.numpy as jnp
from jax.experimental import pallas as pl
from jax.experimental.pallas import tpu as pltpu

HIDDEN = 256  # fixed by the module (l1/l2/l3 are 256-wide)


def _ar_mlp_kernel(state_ref, action_ref, w1s_ref, w1a_ref, w1o_ref, b_ref,
                   w2_ref, w3_ref, o_ref, h1_buf):
    Bt = state_ref.shape[0]
    A = action_ref.shape[1]
    H = w2_ref.shape[0]
    cdt = w2_ref.dtype  # compute dtype for MXU operands (bf16 by default)

    state = state_ref[...]
    action = action_ref[...].astype(jnp.float32)
    w1a = w1a_ref[...]                      # (A, H) f32, VPU-only use
    b1 = b_ref[0:1, :]                      # (1, H) f32
    b2 = b_ref[1:2, :]
    b3 = b_ref[2:3, :]

    # ---- layer 1, all A autoregressive steps -------------------------------
    # Shared state contribution: one small matmul for all steps (f32 acc).
    hs = jnp.dot(state.astype(cdt), w1s_ref[...],
                 preferred_element_type=jnp.float32) + b1          # (Bt, H)

    # Running masked-action contribution: step i adds sum_{j<i} a_j * W1a[j].
    acc = jnp.zeros_like(hs)
    for a in range(A):                       # A is small & static -> unrolled
        h1 = jnp.maximum(hs + acc + w1o_ref[a:a + 1, :], 0.0)      # (Bt, H)
        h1_buf[a * Bt:(a + 1) * Bt, :] = h1                        # f32 scratch
        if a + 1 < A:
            # outer product action[:, a] (Bt,1) x W1a[a] (1,H) — pure VPU.
            acc = acc + action[:, a:a + 1] * w1a[a:a + 1, :]

    # ---- layers 2 & 3, batched over all A steps (M = A*Bt) ------------------
    h1_all = h1_buf[...].astype(cdt)                               # (A*Bt, H)
    h2 = jnp.maximum(
        jnp.dot(h1_all, w2_ref[...], preferred_element_type=jnp.float32) + b2,
        0.0)
    out = jnp.dot(h2.astype(cdt), w3_ref[...],
                  preferred_element_type=jnp.float32) + b3         # (A*Bt, H)

    # ---- store directly in final (B, A*H) layout (lane-dense, 128-aligned) --
    for a in range(A):
        o_ref[:, a * H:(a + 1) * H] = out[a * Bt:(a + 1) * Bt, :].astype(o_ref.dtype)


def _pick_batch_tile(B, max_bt):
    if B <= max_bt:
        return B
    for bt in (max_bt, 128, 64, 32, 16, 8):
        if bt <= max_bt and B % bt == 0:
            return bt
    return B


def autoregressive_forward(state, action, params, *,
                           compute_dtype=jnp.bfloat16, max_batch_tile=256):
    """state: (B, S) f32, action: (B, A) f32 -> (B, 256*A) f32."""
    w1, b1, w2, b2, w3, b3 = params
    B, S = state.shape
    A = action.shape[1]
    H = w2.shape[0]
    assert w1.shape == (S + 2 * A, H), w1.shape

    # Split l1's weight by input section; no x_stack is ever materialized.
    w1s = w1[:S].astype(compute_dtype)             # state rows   -> MXU (bf16)
    w1a = w1[S:S + A].astype(jnp.float32)          # action rows  -> VPU outer products
    w1o = w1[S + A:].astype(jnp.float32)           # one-hot rows -> additive row select
    biases = jnp.concatenate([b1, b2, b3], axis=0).astype(jnp.float32)  # (3, H)
    w2c = w2.astype(compute_dtype)
    w3c = w3.astype(compute_dtype)

    bt = _pick_batch_tile(B, max_batch_tile)       # M tile; weights stay resident
    nb = B // bt

    out = pl.pallas_call(
        _ar_mlp_kernel,
        out_shape=jax.ShapeDtypeStruct((B, A * H), jnp.float32),
        grid=(nb,),
        in_specs=[
            pl.BlockSpec((bt, S), lambda b: (b, 0)),       # state tile
            pl.BlockSpec((bt, A), lambda b: (b, 0)),       # action tile
            pl.BlockSpec((S, H), lambda b: (0, 0)),        # W1 state rows (resident)
            pl.BlockSpec((A, H), lambda b: (0, 0)),        # W1 action rows
            pl.BlockSpec((A, H), lambda b: (0, 0)),        # W1 one-hot rows
            pl.BlockSpec((3, H), lambda b: (0, 0)),        # packed biases
            pl.BlockSpec((H, H), lambda b: (0, 0)),        # W2
            pl.BlockSpec((H, H), lambda b: (0, 0)),        # W3
        ],
        out_specs=pl.BlockSpec((bt, A * H), lambda b: (b, 0)),
        scratch_shapes=[pltpu.VMEM((A * bt, H), jnp.float32)],   # stacked h1
        compiler_params=pltpu.CompilerParams(
            dimension_semantics=("parallel",)),
    )(state, action, w1s, w1a, w1o, biases, w2c, w3c)
    return out


def init_params(key, state_dim, action_dim):
    """Deterministic synthetic params (shapes match nn.Linear layers l1..l3)."""
    d_in = state_dim + 2 * action_dim
    ks = jax.random.split(key, 6)
    w1 = jax.random.normal(ks[0], (d_in, HIDDEN), jnp.float32) * 0.05
    b1 = jax.random.normal(ks[1], (1, HIDDEN), jnp.float32) * 0.05
    w2 = jax.random.normal(ks[2], (HIDDEN, HIDDEN), jnp.float32) * 0.05
    b2 = jax.random.normal(ks[3], (1, HIDDEN), jnp.float32) * 0.05
    w3 = jax.random.normal(ks[4], (HIDDEN, HIDDEN), jnp.float32) * 0.05
    b3 = jax.random.normal(ks[5], (1, HIDDEN), jnp.float32) * 0.05
    # TODO(synk): l4 (256 -> num_bin) exists in __init__ but is unused by forward(); omitted.
    return (w1, b1, w2, b2, w3, b3)


def reference_forward(state, action, params):
    w1, b1, w2, b2, w3, b3 = params
    B = state.shape[0]
    A = action.shape[1]
    hp = jax.lax.Precision.HIGHEST
    eye = jnp.eye(A, dtype=jnp.float32)
    outs = []
    for i in range(A):
        mask = (jnp.arange(A) < i).astype(jnp.float32)
        x = jnp.concatenate(
            [state, action * mask[None, :],
             jnp.broadcast_to(eye[i][None, :], (B, A))], axis=1)
        h = jnp.maximum(jnp.dot(x, w1, precision=hp) + b1, 0.0)
        h = jnp.maximum(jnp.dot(h, w2, precision=hp) + b2, 0.0)
        outs.append(jnp.dot(h, w3, precision=hp) + b3)
    return jnp.concatenate(outs, axis=1)


if __name__ == "__main__":
    key = jax.random.PRNGKey(0)
    B, state_dim, action_dim = 8, 6, 3
    k_s, k_a, k_p = jax.random.split(key, 3)
    state = jax.random.normal(k_s, (B, state_dim), jnp.float32)
    action = jnp.clip(jax.random.normal(k_a, (B, action_dim), jnp.float32), -1.0, 1.0)
    params = init_params(k_p, state_dim, action_dim)

    ref = reference_forward(state, action, params)

    # f32 path: tight structural/semantic check of the fused kernel.
    out_f32 = jax.block_until_ready(
        autoregressive_forward(state, action, params, compute_dtype=jnp.float32))
    assert out_f32.shape == (B, action_dim * HIDDEN), out_f32.shape
    assert jnp.allclose(out_f32, ref, atol=2e-3, rtol=2e-3), \
        float(jnp.max(jnp.abs(out_f32 - ref)))

    # bf16 path (default, MXU-optimized operands with f32 accumulation).
    out_bf16 = jax.block_until_ready(autoregressive_forward(state, action, params))
    assert out_bf16.shape == (B, action_dim * HIDDEN), out_bf16.shape
    assert jnp.allclose(out_bf16, ref, atol=2e-2, rtol=2e-2), \
        float(jnp.max(jnp.abs(out_bf16 - ref)))

    print("KERNEL_OK")
</pallas_src>

<mosaic_0001>
module attributes {stable_mosaic.version = 11 : i64} {
  func.func @_ar_mlp_kernel(%arg0: i32, %arg1: memref<8x6xf32, #tpu.memory_space<vmem>>, %arg2: memref<8x3xf32, #tpu.memory_space<vmem>>, %arg3: memref<6x256xf32, #tpu.memory_space<vmem>>, %arg4: memref<3x256xf32, #tpu.memory_space<vmem>>, %arg5: memref<3x256xf32, #tpu.memory_space<vmem>>, %arg6: memref<3x256xf32, #tpu.memory_space<vmem>>, %arg7: memref<256x256xf32, #tpu.memory_space<vmem>>, %arg8: memref<256x256xf32, #tpu.memory_space<vmem>>, %arg9: memref<8x768xf32, #tpu.memory_space<vmem>>, %arg10: memref<24x256xf32, #tpu.memory_space<vmem>>) attributes {dimension_semantics = [#tpu.dimension_semantics<parallel>], iteration_bounds = array<i64: 1>, scalar_prefetch = 0 : i64, scratch_operands = 1 : i64, tpu.core_type = #tpu.core_type<tc>, window_params = [{transform_indices = @transform_0, window_bounds = array<i64: 8, 6>}, {transform_indices = @transform_1, window_bounds = array<i64: 8, 3>}, {pipeline_mode = #tpu.pipeline_mode<synchronous>, transform_indices = @transform_2, window_bounds = array<i64: 6, 256>}, {pipeline_mode = #tpu.pipeline_mode<synchronous>, transform_indices = @transform_3, window_bounds = array<i64: 3, 256>}, {pipeline_mode = #tpu.pipeline_mode<synchronous>, transform_indices = @transform_4, window_bounds = array<i64: 3, 256>}, {pipeline_mode = #tpu.pipeline_mode<synchronous>, transform_indices = @transform_5, window_bounds = array<i64: 3, 256>}, {pipeline_mode = #tpu.pipeline_mode<synchronous>, transform_indices = @transform_6, window_bounds = array<i64: 256, 256>}, {pipeline_mode = #tpu.pipeline_mode<synchronous>, transform_indices = @transform_7, window_bounds = array<i64: 256, 256>}, {transform_indices = @transform_8, window_bounds = array<i64: 8, 768>}]} {
    %c0 = arith.constant 0 : index
    %c0_0 = arith.constant 0 : index
    %0 = vector.load %arg1[%c0, %c0_0] : memref<8x6xf32, #tpu.memory_space<vmem>>, vector<8x6xf32>
    %c0_1 = arith.constant 0 : index
    %c0_2 = arith.constant 0 : index
    %1 = vector.load %arg2[%c0_1, %c0_2] : memref<8x3xf32, #tpu.memory_space<vmem>>, vector<8x3xf32>
    %c0_3 = arith.constant 0 : index
    %c0_4 = arith.constant 0 : index
    %2 = vector.load %arg4[%c0_3, %c0_4] : memref<3x256xf32, #tpu.memory_space<vmem>>, vector<3x256xf32>
    %c0_5 = arith.constant 0 : index
    %c0_6 = arith.constant 0 : index
    %3 = vector.load %arg6[%c0_5, %c0_6] : memref<3x256xf32, #tpu.memory_space<vmem>>, vector<1x256xf32>
    %c1 = arith.constant 1 : index
    %c0_7 = arith.constant 0 : index
    %4 = vector.load %arg6[%c1, %c0_7] : memref<3x256xf32, #tpu.memory_space<vmem>>, vector<1x256xf32>
    %c2 = arith.constant 2 : index
    %c0_8 = arith.constant 0 : index
    %5 = vector.load %arg6[%c2, %c0_8] : memref<3x256xf32, #tpu.memory_space<vmem>>, vector<1x256xf32>
    %c0_9 = arith.constant 0 : index
    %c0_10 = arith.constant 0 : index
    %6 = vector.load %arg3[%c0_9, %c0_10] : memref<6x256xf32, #tpu.memory_space<vmem>>, vector<6x256xf32>
    %cst = arith.constant dense<0.000000e+00> : vector<8x256xf32>
    %7 = tpu.matmul %0, %6, %cst {dimension_numbers = #tpu.dot_dimension_numbers<[1], [0], [0], [1], [0, 0, 1, 1], [], []>} : vector<8x6xf32>, vector<6x256xf32>, vector<8x256xf32> -> vector<8x256xf32>
    %8 = vector.broadcast %3 : vector<1x256xf32> to vector<8x256xf32>
    %9 = arith.addf %7, %8 : vector<8x256xf32>
    %cst_11 = arith.constant 0.000000e+00 : f32
    %10 = vector.broadcast %cst_11 : f32 to vector<8x256xf32>
    %11 = arith.addf %9, %10 : vector<8x256xf32>
    %c0_12 = arith.constant 0 : index
    %c0_13 = arith.constant 0 : index
    %12 = vector.load %arg5[%c0_12, %c0_13] : memref<3x256xf32, #tpu.memory_space<vmem>>, vector<1x256xf32>
    %13 = vector.broadcast %12 : vector<1x256xf32> to vector<8x256xf32>
    %14 = arith.addf %11, %13 : vector<8x256xf32>
    %cst_14 = arith.constant 0.000000e+00 : f32
    %15 = vector.broadcast %cst_14 : f32 to vector<8x256xf32>
    %16 = arith.maximumf %14, %15 : vector<8x256xf32>
    %c0_15 = arith.constant 0 : index
    %c0_16 = arith.constant 0 : index
    %17 = vector.load %arg10[%c0_15, %c0_16] : memref<24x256xf32, #tpu.memory_space<vmem>>, vector<8x256xf32>
    tpu.vector_store %arg10[%c0_15, %c0_16], %16 {strides = array<i32>} : memref<24x256xf32, #tpu.memory_space<vmem>>, vector<8x256xf32>,
    %18 = vector.extract_strided_slice %1 {offsets = [0, 0], sizes = [8, 1], strides = [1, 1]} : vector<8x3xf32> to vector<8x1xf32>
    %19 = vector.extract_strided_slice %2 {offsets = [0, 0], sizes = [1, 256], strides = [1, 1]} : vector<3x256xf32> to vector<1x256xf32>
    %20 = vector.broadcast %18 : vector<8x1xf32> to vector<8x256xf32>
    %21 = vector.broadcast %19 : vector<1x256xf32> to vector<8x256xf32>
    %22 = arith.mulf %20, %21 : vector<8x256xf32>
    %23 = arith.addf %10, %22 : vector<8x256xf32>
    %24 = arith.addf %9, %23 : vector<8x256xf32>
    %c1_17 = arith.constant 1 : index
    %c0_18 = arith.constant 0 : index
    %25 = vector.load %arg5[%c1_17, %c0_18] : memref<3x256xf32, #tpu.memory_space<vmem>>, vector<1x256xf32>
    %26 = vector.broadcast %25 : vector<1x256xf32> to vector<8x256xf32>
    %27 = arith.addf %24, %26 : vector<8x256xf32>
    %cst_19 = arith.constant 0.000000e+00 : f32
    %28 = vector.broadcast %cst_19 : f32 to vector<8x256xf32>
    %29 = arith.maximumf %27, %28 : vector<8x256xf32>
    %c8 = arith.constant 8 : index
    %c0_20 = arith.constant 0 : index
    %30 = vector.load %arg10[%c8, %c0_20] : memref<24x256xf32, #tpu.memory_space<vmem>>, vector<8x256xf32>
    tpu.vector_store %arg10[%c8, %c0_20], %29 {strides = array<i32>} : memref<24x256xf32, #tpu.memory_space<vmem>>, vector<8x256xf32>,
    %31 = vector.extract_strided_slice %1 {offsets = [0, 1], sizes = [8, 1], strides = [1, 1]} : vector<8x3xf32> to vector<8x1xf32>
    %32 = vector.extract_strided_slice %2 {offsets = [1, 0], sizes = [1, 256], strides = [1, 1]} : vector<3x256xf32> to vector<1x256xf32>
    %33 = vector.broadcast %31 : vector<8x1xf32> to vector<8x256xf32>
    %34 = vector.broadcast %32 : vector<1x256xf32> to vector<8x256xf32>
    %35 = arith.mulf %33, %34 : vector<8x256xf32>
    %36 = arith.addf %23, %35 : vector<8x256xf32>
    %37 = arith.addf %9, %36 : vector<8x256xf32>
    %c2_21 = arith.constant 2 : index
    %c0_22 = arith.constant 0 : index
    %38 = vector.load %arg5[%c2_21, %c0_22] : memref<3x256xf32, #tpu.memory_space<vmem>>, vector<1x256xf32>
    %39 = vector.broadcast %38 : vector<1x256xf32> to vector<8x256xf32>
    %40 = arith.addf %37, %39 : vector<8x256xf32>
    %cst_23 = arith.constant 0.000000e+00 : f32
    %41 = vector.broadcast %cst_23 : f32 to vector<8x256xf32>
    %42 = arith.maximumf %40, %41 : vector<8x256xf32>
    %c16 = arith.constant 16 : index
    %c0_24 = arith.constant 0 : index
    %43 = vector.load %arg10[%c16, %c0_24] : memref<24x256xf32, #tpu.memory_space<vmem>>, vector<8x256xf32>
    tpu.vector_store %arg10[%c16, %c0_24], %42 {strides = array<i32>} : memref<24x256xf32, #tpu.memory_space<vmem>>, vector<8x256xf32>,
    %c0_25 = arith.constant 0 : index
    %c0_26 = arith.constant 0 : index
    %44 = vector.load %arg10[%c0_25, %c0_26] : memref<24x256xf32, #tpu.memory_space<vmem>>, vector<24x256xf32>
    %c0_27 = arith.constant 0 : index
    %c0_28 = arith.constant 0 : index
    %45 = vector.load %arg7[%c0_27, %c0_28] : memref<256x256xf32, #tpu.memory_space<vmem>>, vector<256x256xf32>
    %cst_29 = arith.constant dense<0.000000e+00> : vector<24x256xf32>
    %46 = tpu.matmul %44, %45, %cst_29 {dimension_numbers = #tpu.dot_dimension_numbers<[1], [0], [0], [1], [0, 0, 1, 1], [], []>} : vector<24x256xf32>, vector<256x256xf32>, vector<24x256xf32> -> vector<24x256xf32>
    %47 = vector.broadcast %4 : vector<1x256xf32> to vector<24x256xf32>
    %48 = arith.addf %46, %47 : vector<24x256xf32>
    %cst_30 = arith.constant 0.000000e+00 : f32
    %49 = vector.broadcast %cst_30 : f32 to vector<24x256xf32>
    %50 = arith.maximumf %48, %49 : vector<24x256xf32>
    %c0_31 = arith.constant 0 : index
    %c0_32 = arith.constant 0 : index
    %51 = vector.load %arg8[%c0_31, %c0_32] : memref<256x256xf32, #tpu.memory_space<vmem>>, vector<256x256xf32>
    %cst_33 = arith.constant dense<0.000000e+00> : vector<24x256xf32>
    %52 = tpu.matmul %50, %51, %cst_33 {dimension_numbers = #tpu.dot_dimension_numbers<[1], [0], [0], [1], [0, 0, 1, 1], [], []>} : vector<24x256xf32>, vector<256x256xf32>, vector<24x256xf32> -> vector<24x256xf32>
    %53 = vector.broadcast %5 : vector<1x256xf32> to vector<24x256xf32>
    %54 = arith.addf %52, %53 : vector<24x256xf32>
    %55 = vector.extract_strided_slice %54 {offsets = [0, 0], sizes = [8, 256], strides = [1, 1]} : vector<24x256xf32> to vector<8x256xf32>
    %c0_34 = arith.constant 0 : index
    %c0_35 = arith.constant 0 : index
    %56 = vector.load %arg9[%c0_34, %c0_35] : memref<8x768xf32, #tpu.memory_space<vmem>>, vector<8x256xf32>
    tpu.vector_store %arg9[%c0_34, %c0_35], %55 {strides = array<i32>} : memref<8x768xf32, #tpu.memory_space<vmem>>, vector<8x256xf32>,
    %57 = vector.extract_strided_slice %54 {offsets = [8, 0], sizes = [8, 256], strides = [1, 1]} : vector<24x256xf32> to vector<8x256xf32>
    %c0_36 = arith.constant 0 : index
    %c256 = arith.constant 256 : index
    %58 = vector.load %arg9[%c0_36, %c256] : memref<8x768xf32, #tpu.memory_space<vmem>>, vector<8x256xf32>
    tpu.vector_store %arg9[%c0_36, %c256], %57 {strides = array<i32>} : memref<8x768xf32, #tpu.memory_space<vmem>>, vector<8x256xf32>,
    %59 = vector.extract_strided_slice %54 {offsets = [16, 0], sizes = [8, 256], strides = [1, 1]} : vector<24x256xf32> to vector<8x256xf32>
    %c0_37 = arith.constant 0 : index
    %c512 = arith.constant 512 : index
    %60 = vector.load %arg9[%c0_37, %c512] : memref<8x768xf32, #tpu.memory_space<vmem>>, vector<8x256xf32>
    tpu.vector_store %arg9[%c0_37, %c512], %59 {strides = array<i32>} : memref<8x768xf32, #tpu.memory_space<vmem>>, vector<8x256xf32>,
    return
  }
  func.func @transform_0(%arg0: i32) -> (i32, i32) {
    %c0_i32 = arith.constant 0 : i32
    %c0_i32_0 = arith.constant 0 : i32
    return %arg0, %c0_i32 : i32, i32
  }
  func.func @transform_1(%arg0: i32) -> (i32, i32) {
    %c0_i32 = arith.constant 0 : i32
    %c0_i32_0 = arith.constant 0 : i32
    return %arg0, %c0_i32 : i32, i32
  }
  func.func @transform_2(%arg0: i32) -> (i32, i32) {
    %c0_i32 = arith.constant 0 : i32
    %c0_i32_0 = arith.constant 0 : i32
    %c0_i32_1 = arith.constant 0 : i32
    return %c0_i32, %c0_i32_0 : i32, i32
  }
  func.func @transform_3(%arg0: i32) -> (i32, i32) {
    %c0_i32 = arith.constant 0 : i32
    %c0_i32_0 = arith.constant 0 : i32
    %c0_i32_1 = arith.constant 0 : i32
    return %c0_i32, %c0_i32_0 : i32, i32
  }
  func.func @transform_4(%arg0: i32) -> (i32, i32) {
    %c0_i32 = arith.constant 0 : i32
    %c0_i32_0 = arith.constant 0 : i32
    %c0_i32_1 = arith.constant 0 : i32
    return %c0_i32, %c0_i32_0 : i32, i32
  }
  func.func @transform_5(%arg0: i32) -> (i32, i32) {
    %c0_i32 = arith.constant 0 : i32
    %c0_i32_0 = arith.constant 0 : i32
    %c0_i32_1 = arith.constant 0 : i32
    return %c0_i32, %c0_i32_0 : i32, i32
  }
  func.func @transform_6(%arg0: i32) -> (i32, i32) {
    %c0_i32 = arith.constant 0 : i32
    %c0_i32_0 = arith.constant 0 : i32
    %c0_i32_1 = arith.constant 0 : i32
    return %c0_i32, %c0_i32_0 : i32, i32
  }
  func.func @transform_7(%arg0: i32) -> (i32, i32) {
    %c0_i32 = arith.constant 0 : i32
    %c0_i32_0 = arith.constant 0 : i32
    %c0_i32_1 = arith.constant 0 : i32
    return %c0_i32, %c0_i32_0 : i32, i32
  }
  func.func @transform_8(%arg0: i32) -> (i32, i32) {
    %c0_i32 = arith.constant 0 : i32
    %c0_i32_0 = arith.constant 0 : i32
    return %arg0, %c0_i32 : i32, i32
  }
}

</mosaic_0001>

<bundles_post_ra>
// kernel: tpu_custom_call.1
= control target key start
LH: loop header
LB: loop body
LE: loop exit
PB: predicated region body
PF: predicated region fallthrough
CT: control target
= control target key end

     0   :  { %13 = vsyncpa [#allocation4], 0  ;;  %s1129_s0 = inlined_call_operand.hbm [shape: f32[8,6], index: 0, kind: input, shape index: {}]   ;;  %s1130_s1 = inlined_call_operand.vmem [shape: f32[8,3], index: 1, kind: input, shape index: {}]   ;;  %s1131_s2 = inlined_call_operand.vmem [shape: f32[6,256], index: 2, kind: input, shape index: {}]   ;;  %s1132_s3 = inlined_call_operand.hbm [shape: f32[3,256], index: 3, kind: input, shape index: {}]   ;;  %s1133_s4 = inlined_call_operand.vmem [shape: f32[3,256], index: 4, kind: input, shape index: {}]   ;;  %s1134_s5 = inlined_call_operand.hbm [shape: f32[3,256], index: 5, kind: input, shape index: {}]   ;;  %s1135_s6 = inlined_call_operand.hbm [shape: f32[256,256], index: 6, kind: input, shape index: {}]   ;;  %s1136_s7 = inlined_call_operand.hbm [shape: f32[256,256], index: 7, kind: input, shape index: {}]   ;;  %s1137_s8 = inlined_call_operand.hbm [shape: f32[8,768], index: 8, kind: output, shape index: {}]  }
   0x1   :  { %14 = vsyncpa [#allocation7], 0 }
   0x2   :  { %15 = vsyncpa [#allocation10], 0 }
   0x3   :  { %16 = vsyncpa [#allocation5], 0  ;;  %s948_s27 = smov [#allocation6]   ;;  %s949_s29 = smov [#allocation9]  }
   0x4   :  { %s37_s28 = sshll.u32 %s948_s27, 4  ;;  %s58_s30 = sshll.u32 %s949_s29, 4  ;;  %s38_s28 = int_to_ptr.vmem [resolvable:$true] %s37_s28  ;;  %s1004_s30 = int_to_ptr.vmem [resolvable:$true] %s58_s30 }
   0x5   :  { %s808_s11 = scalar_lea.hbm %s1132_s3, 128 }
   0x6   :  { %p809_p0 = scmp.ne.s32.totalorder %s1132_s3, %s808_s11  ;;  %p812_p1 = scmp.lt.u32.totalorder %s808_s11, %s1132_s3 }
   0x8   :  { %p814_p2 = pnand %p812_p1, %p809_p0 }
   0xa   :  { %817 = shalt.err (!%p814_p2)
}
   0xb   :  { %s818_s16 = scalar_lea.vmem %s38_s28, 128  ;;  %p823_p4 = scmp.lt.s32.totalorder %s38_s28, %s38_s28 }
   0xc   :  { %p819_p3 = scmp.ne.s32.totalorder %s38_s28, %s818_s16  ;;  %p824_p5 = scmp.lt.s32.totalorder %s818_s16, %s818_s16 }
   0xe   :  { %p825_p6 = por %p824_p5, %p823_p4 }
  0x10   :  { %p826_p7 = pnand %p825_p6, %p819_p3 }
  0x12   :  { %829 = shalt.err (!%p826_p7)
}
  0x13   :  { %40 = dma.hbm_to_vmem [thread:$0]  %s1132_s3, 128, %s38_s28, [#allocation7]  }
  0x14   :  { %s830_s21 = scalar_lea.hbm %s1135_s6, 8192 }
  0x15   :  { %p831_p8 = scmp.ne.s32.totalorder %s1135_s6, %s830_s21  ;;  %p834_p9 = scmp.lt.u32.totalorder %s830_s21, %s1135_s6 }
  0x17   :  { %p836_p10 = pnand %p834_p9, %p831_p8 }
  0x19   :  { %839 = shalt.err (!%p836_p10)
}
  0x1a   :  { %s840_s26 = scalar_lea.vmem %s1004_s30, 8192  ;;  %p845_p12 = scmp.lt.s32.totalorder %s1004_s30, %s1004_s30 }
  0x1b   :  { %p841_p11 = scmp.ne.s32.totalorder %s1004_s30, %s840_s26  ;;  %p846_p13 = scmp.lt.s32.totalorder %s840_s26, %s840_s26 }
  0x1d   :  { %p847_p0 = por %p846_p13, %p845_p12 }
  0x1f   :  { %p848_p1 = pnand %p847_p0, %p841_p11 }
  0x21   :  { %851 = shalt.err (!%p848_p1)
}
  0x22   :  { %s950_s3 = smov 256   ;;  %s951_s27 = smov 16  }
  0x23   :  { %64 = dma.hbm_to_vmem [thread:$0]  %s1135_s6, 8192, %s1004_s30, [#allocation10], %s950_s3, %s950_s3, %s951_s27  }
  0x24   :  { %s952_s9 = smov [#allocation3]   ;;  %s953_s11 = smov [#allocation8]  }
  0x25   :  { %s23_s10 = sshll.u32 %s952_s9, 4  ;;  %s49_s12 = sshll.u32 %s953_s11, 4  ;;  %s24_s10 = int_to_ptr.vmem [resolvable:$true] %s23_s10  ;;  %s50_s12 = int_to_ptr.vmem [resolvable:$true] %s49_s12 }
  0x26   :  { %s852_s15 = scalar_lea.hbm %s1129_s0, 128 }
  0x27   :  { %p853_p2 = scmp.ne.s32.totalorder %s1129_s0, %s852_s15  ;;  %p856_p3 = scmp.lt.u32.totalorder %s852_s15, %s1129_s0 }
  0x29   :  { %p858_p4 = pnand %p856_p3, %p853_p2 }
  0x2b   :  { %861 = shalt.err (!%p858_p4)
}
  0x2c   :  { %s862_s6 = scalar_lea.vmem %s24_s10, 128  ;;  %p867_p6 = scmp.lt.s32.totalorder %s24_s10, %s24_s10 }
  0x2d   :  { %p863_p5 = scmp.ne.s32.totalorder %s24_s10, %s862_s6  ;;  %p868_p7 = scmp.lt.s32.totalorder %s862_s6, %s862_s6 }
  0x2f   :  { %p869_p8 = por %p868_p7, %p867_p6 }
  0x31   :  { %p870_p9 = pnand %p869_p8, %p863_p5 }
  0x33   :  { %873 = shalt.err (!%p870_p9)
}
  0x34   :  { %26 = dma.hbm_to_vmem [thread:$0]  %s1129_s0, 128, %s24_s10, [#allocation4]  }
  0x35   :  { %s874_s23 = scalar_lea.hbm %s1134_s5, 128 }
  0x36   :  { %p875_p10 = scmp.ne.s32.totalorder %s1134_s5, %s874_s23  ;;  %p878_p11 = scmp.lt.u32.totalorder %s874_s23, %s1134_s5 }
  0x38   :  { %p880_p12 = pnand %p878_p11, %p875_p10 }
  0x3a   :  { %883 = shalt.err (!%p880_p12)
}
  0x3b   :  { %s884_s29 = scalar_lea.vmem %s50_s12, 128  ;;  %p889_p0 = scmp.lt.s32.totalorder %s50_s12, %s50_s12 }
  0x3c   :  { %p885_p13 = scmp.ne.s32.totalorder %s50_s12, %s884_s29  ;;  %p890_p1 = scmp.lt.s32.totalorder %s884_s29, %s884_s29 }
  0x3e   :  { %p891_p2 = por %p890_p1, %p889_p0 }
  0x40   :  { %p892_p3 = pnand %p891_p2, %p885_p13 }
  0x42   :  { %895 = shalt.err (!%p892_p3)
}
  0x43   :  { %52 = dma.hbm_to_vmem [thread:$0]  %s1134_s5, 128, %s50_s12, [#allocation7]  }
  0x44   :  { %s954_s10 = smov [#allocation11]   ;;  %s896_s15 = scalar_lea.hbm %s1136_s7, 8192 }
  0x45   :  { %s70_s11 = sshll.u32 %s954_s10, 4  ;;  %p897_p4 = scmp.ne.s32.totalorder %s1136_s7, %s896_s15  ;;  %s71_s11 = int_to_ptr.vmem [resolvable:$true] %s70_s11 }
  0x46   :  { %p900_p5 = scmp.lt.u32.totalorder %s896_s15, %s1136_s7 }
  0x48   :  { %p902_p6 = pnand %p900_p5, %p897_p4 }
  0x4a   :  { %905 = shalt.err (!%p902_p6)
}
  0x4b   :  { %s906_s6 = scalar_lea.vmem %s71_s11, 8192  ;;  %p911_p8 = scmp.lt.s32.totalorder %s71_s11, %s71_s11 }
  0x4c   :  { %p907_p7 = scmp.ne.s32.totalorder %s71_s11, %s906_s6  ;;  %p912_p9 = scmp.lt.s32.totalorder %s906_s6, %s906_s6 }
  0x4e   :  { %p913_p10 = por %p912_p9, %p911_p8 }
  0x50   :  { %p914_p11 = pnand %p913_p10, %p907_p7 }
  0x52   :  { %917 = shalt.err (!%p914_p11)
}
  0x53   :  { %76 = dma.hbm_to_vmem [thread:$0]  %s1136_s7, 8192, %s71_s11, [#allocation10], %s950_s3, %s950_s3, %s951_s27  }
  0x54   :  { %940 = dma.done.wait [#allocation4], 128  }
  0x55   :  { %941 = vsyncadd [#allocation4], 4294967168 }
  0x56   :  { %942 = dma.done.wait [#allocation7], 256  }
  0x57   :  { %943 = vsyncadd [#allocation7], 4294967040 }
  0x58   :  { %944 = dma.done.wait [#allocation10], 16384  }
  0x59   :  { %945 = vsyncadd [#allocation10], 4294950912  ;;  %v955_v0 = vmov 0.0   ;;  %v956_v1 = vmov 0   ;;  %vm117_vm0 = vcmask 1045504   ;;  %v92_v4 = vld [vmem:[#allocation3] sm:$0xff] }
  0x5a   :  { %188 = vmatprep.mubr.f32.mxu0 %v955_v0  ;;  %806 = vset.pattern.permute.xlu0 %v956_v1  ;;  %v101_v2 = vld [vmem:[%s1131_s2 + $0x8] sm:$0x3f]  ;;  %v100_v3 = vld [vmem:[%s1131_s2] sm:$0x3f]  ;;  %vm113_vm1 = vcmask 48128   ;;  %v320_v7 = vld [vmem:[#allocation9 + $0x18] sm:$0xff] }
  0x5b   :  { %662 = vmatprep.subr.msk.mxu0 %vm117_vm0, %v101_v2  ;;  %v93_v5 = vld [vmem:[%s1130_s1] sm:$0xff]  ;;  %v317_v9 = vld [vmem:[#allocation9] sm:$0xff]  ;;  %v319_v10 = vld [vmem:[#allocation9 + $0x10] sm:$0xff]  ;;  %v957_v20 = vmov 1  }
  0x5c   :  { %v318_v6 = vld [vmem:[#allocation9 + $0x8] sm:$0xff]  ;;  %663 = vmatpush1.msk.msra.mxu0 %vm117_vm0, %v100_v3  ;;  %217 = vperm.xlu0 %806, %v93_v5   ;;  %v669_v12 = vpack.c.bf16 %v319_v10, %v317_v9  ;;  %v324_v13 = vld [vmem:[#allocation9 + $0x38] sm:$0xff]  ;;  %v321_v14 = vld [vmem:[#allocation9 + $0x20] sm:$0xff] }
  0x5d   :  { %v667_v8 = vpack.c.bf16 %v320_v7, %v318_v6  ;;  %v322_v11 = vld [vmem:[#allocation9 + $0x28] sm:$0xff]  ;;  %664 = vmatmul.mubr.msk.f32.vlgmr.msra.gmra.mrb[0].mxu0 %vm113_vm1, %v92_v4  ;;  %v323_v15 = vld [vmem:[#allocation9 + $0x30] sm:$0xff]  ;;  %v328_v18 = vld [vmem:[#allocation9 + $0x58] sm:$0xff] }
  0x5e   :  { %v671_v16 = vpack.c.bf16 %v324_v13, %v322_v11  ;;  %v326_v17 = vld [vmem:[#allocation9 + $0x48] sm:$0xff]  ;;  %v673_v19 = vpack.c.bf16 %v323_v15, %v321_v14  ;;  %v325_v22 = vld [vmem:[#allocation9 + $0x40] sm:$0xff]  ;;  %v327_v23 = vld [vmem:[#allocation9 + $0x50] sm:$0xff] }
  0x5f   :  { %668 = vmatprep.subr.bf16.mxu1 %v667_v8  ;;  %v675_v21 = vpack.c.bf16 %v328_v18, %v326_v17  ;;  %v330_v24 = vld [vmem:[#allocation9 + $0x68] sm:$0xff]  ;;  %v332_v25 = vld [vmem:[#allocation9 + $0x78] sm:$0xff]  ;;  %v677_v26 = vpack.c.bf16 %v327_v23, %v325_v22  ;;  %v329_v28 = vld [vmem:[#allocation9 + $0x60] sm:$0xff] }
  0x60   :  { %670 = vmatpush1.bf16.msra.mxu1 %v669_v12  ;;  %807 = vset.pattern.permute.xlu0 %v957_v20  ;;  %v679_v27 = vpack.c.bf16 %v332_v25, %v330_v24  ;;  %v331_v29 = vld [vmem:[#allocation9 + $0x70] sm:$0xff]  ;;  %v334_v30 = vld [vmem:[#allocation9 + $0x88] sm:$0xff]  ;;  %v336_v31 = vld [vmem:[#allocation9 + $0x98] sm:$0xff] }
  0x61   :  { %672 = vmatprep.subr.bf16.mxu1 %v671_v16  ;;  %265 = vperm.xlu0 %807, %v93_v5   ;;  %v681_v32 = vpack.c.bf16 %v331_v29, %v329_v28  ;;  %v683_v33 = vpack.c.bf16 %v336_v31, %v334_v30  ;;  %v333_v34 = vld [vmem:[#allocation9 + $0x80] sm:$0xff]  ;;  %v335_v35 = vld [vmem:[#allocation9 + $0x90] sm:$0xff]  ;;  %v338_v36 = vld [vmem:[#allocation9 + $0xa8] sm:$0xff] }
  0x62   :  { %v340_v37 = vld [vmem:[#allocation9 + $0xb8] sm:$0xff]  ;;  %v685_v38 = vpack.c.bf16 %v335_v35, %v333_v34  ;;  %v337_v40 = vld [vmem:[#allocation9 + $0xa0] sm:$0xff]  ;;  %v339_v41 = vld [vmem:[#allocation9 + $0xb0] sm:$0xff] }
  0x63   :  { %v687_v39 = vpack.c.bf16 %v340_v37, %v338_v36  ;;  %v342_v42 = vld [vmem:[#allocation9 + $0xc8] sm:$0xff]  ;;  %v344_v43 = vld [vmem:[#allocation9 + $0xd8] sm:$0xff]  ;;  %v689_v44 = vpack.c.bf16 %v339_v41, %v337_v40  ;;  %v341_v46 = vld [vmem:[#allocation9 + $0xc0] sm:$0xff] }
  0x64   :  { %674 = vmatpush1.bf16.msra.mxu1 %v673_v19  ;;  %v691_v45 = vpack.c.bf16 %v344_v43, %v342_v42  ;;  %v343_v47 = vld [vmem:[#allocation9 + $0xd0] sm:$0xff]  ;;  %v346_v48 = vld [vmem:[#allocation9 + $0xe8] sm:$0xff]  ;;  %v348_v49 = vld [vmem:[#allocation9 + $0xf8] sm:$0xff] }
  0x65   :  { %676 = vmatprep.subr.bf16.mxu1 %v675_v21  ;;  %v693_v50 = vpack.c.bf16 %v343_v47, %v341_v46  ;;  %v695_v51 = vpack.c.bf16 %v348_v49, %v346_v48  ;;  %v345_v52 = vld [vmem:[#allocation9 + $0xe0] sm:$0xff]  ;;  %v347_v53 = vld [vmem:[#allocation9 + $0xf0] sm:$0xff]  ;;  %v350_v54 = vld [vmem:[#allocation9 + $0x108] sm:$0xff] }
  0x66   :  { %v352_v55 = vld [vmem:[#allocation9 + $0x118] sm:$0xff]  ;;  %v697_v56 = vpack.c.bf16 %v347_v53, %v345_v52  ;;  %v349_v58 = vld [vmem:[#allocation9 + $0x100] sm:$0xff]  ;;  %v351_v59 = vld [vmem:[#allocation9 + $0x110] sm:$0xff] }
  0x67   :  { %v699_v57 = vpack.c.bf16 %v352_v55, %v350_v54  ;;  %v354_v60 = vld [vmem:[#allocation9 + $0x128] sm:$0xff]  ;;  %v356_v61 = vld [vmem:[#allocation9 + $0x138] sm:$0xff]  ;;  %v701_v62 = vpack.c.bf16 %v351_v59, %v349_v58  ;;  %v353_v0 = vld [vmem:[#allocation9 + $0x120] sm:$0xff] }
  0x68   :  { %678 = vmatpush1.bf16.msra.mxu1 %v677_v26  ;;  %v703_v63 = vpack.c.bf16 %v356_v61, %v354_v60  ;;  %v355_v1 = vld [vmem:[#allocation9 + $0x130] sm:$0xff]  ;;  %v358_v2 = vld [vmem:[#allocation9 + $0x148] sm:$0xff]  ;;  %v360_v3 = vld [vmem:[#allocation9 + $0x158] sm:$0xff] }
  0x69   :  { %680 = vmatprep.subr.bf16.mxu1 %v679_v27  ;;  %v705_v4 = vpack.c.bf16 %v355_v1, %v353_v0  ;;  %v707_v5 = vpack.c.bf16 %v360_v3, %v358_v2  ;;  %v357_v6 = vld [vmem:[#allocation9 + $0x140] sm:$0xff]  ;;  %v359_v7 = vld [vmem:[#allocation9 + $0x150] sm:$0xff]  ;;  %v362_v8 = vld [vmem:[#allocation9 + $0x168] sm:$0xff] }
  0x6a   :  { %v364_v9 = vld [vmem:[#allocation9 + $0x178] sm:$0xff]  ;;  %v709_v10 = vpack.c.bf16 %v359_v7, %v357_v6  ;;  %v361_v12 = vld [vmem:[#allocation9 + $0x160] sm:$0xff]  ;;  %v363_v13 = vld [vmem:[#allocation9 + $0x170] sm:$0xff] }
  0x6b   :  { %v711_v11 = vpack.c.bf16 %v364_v9, %v362_v8  ;;  %v366_v14 = vld [vmem:[#allocation9 + $0x188] sm:$0xff]  ;;  %v368_v15 = vld [vmem:[#allocation9 + $0x198] sm:$0xff]  ;;  %v713_v16 = vpack.c.bf16 %v363_v13, %v361_v12  ;;  %v365_v18 = vld [vmem:[#allocation9 + $0x180] sm:$0xff] }
  0x6c   :  { %682 = vmatpush1.bf16.msra.mxu1 %v681_v32  ;;  %v715_v17 = vpack.c.bf16 %v368_v15, %v366_v14  ;;  %v367_v19 = vld [vmem:[#allocation9 + $0x190] sm:$0xff]  ;;  %v370_v20 = vld [vmem:[#allocation9 + $0x1a8] sm:$0xff]  ;;  %v372_v21 = vld [vmem:[#allocation9 + $0x1b8] sm:$0xff] }
  0x6d   :  { %684 = vmatprep.subr.bf16.mxu1 %v683_v33  ;;  %v717_v22 = vpack.c.bf16 %v367_v19, %v365_v18  ;;  %v719_v23 = vpack.c.bf16 %v372_v21, %v370_v20  ;;  %v369_v24 = vld [vmem:[#allocation9 + $0x1a0] sm:$0xff]  ;;  %v371_v25 = vld [vmem:[#allocation9 + $0x1b0] sm:$0xff]  ;;  %v374_v27 = vld [vmem:[#allocation9 + $0x1c8] sm:$0xff] }
  0x6e   :  { %v721_v26 = vpack.c.bf16 %v371_v25, %v369_v24  ;;  %v376_v28 = vld [vmem:[#allocation9 + $0x1d8] sm:$0xff]  ;;  %v373_v30 = vld [vmem:[#allocation9 + $0x1c0] sm:$0xff]  ;;  %v375_v31 = vld [vmem:[#allocation9 + $0x1d0] sm:$0xff] }
  0x6f   :  { %v723_v29 = vpack.c.bf16 %v376_v28, %v374_v27  ;;  %v725_v32 = vpack.c.bf16 %v375_v31, %v373_v30  ;;  %v378_v33 = vld [vmem:[#allocation9 + $0x1e8] sm:$0xff]  ;;  %v380_v34 = vld [vmem:[#allocation9 + $0x1f8] sm:$0xff]  ;;  %v377_v36 = vld [vmem:[#allocation9 + $0x1e0] sm:$0xff] }
  0x70   :  { %686 = vmatpush1.bf16.msra.mxu1 %v685_v38  ;;  %v727_v35 = vpack.c.bf16 %v380_v34, %v378_v33  ;;  %v379_v37 = vld [vmem:[#allocation9 + $0x1f0] sm:$0xff]  ;;  %v484_v40 = vld [vmem:[#allocation11 + $0x18] sm:$0xff]  ;;  %v481_v41 = vld [vmem:[#allocation11] sm:$0xff] }
  0x71   :  { %688 = vmatprep.subr.bf16.mxu1 %v687_v39  ;;  %v729_v38 = vpack.c.bf16 %v379_v37, %v377_v36  ;;  %v482_v39 = vld [vmem:[#allocation11 + $0x8] sm:$0xff]  ;;  %v483_v43 = vld [vmem:[#allocation11 + $0x10] sm:$0xff]  ;;  %v485_v48 = vld [vmem:[#allocation11 + $0x20] sm:$0xff] }
  0x72   :  { %v731_v42 = vpack.c.bf16 %v484_v40, %v482_v39  ;;  %v733_v46 = vpack.c.bf16 %v483_v43, %v481_v41  ;;  %v487_v49 = vld [vmem:[#allocation11 + $0x30] sm:$0xff]  ;;  %v489_v54 = vld [vmem:[#allocation11 + $0x40] sm:$0xff]  ;;  %v518_v28 = vld [vmem:[#allocation11 + $0x128] sm:$0xff] }
  0x73   :  { %v737_v52 = vpack.c.bf16 %v487_v49, %v485_v48  ;;  %v491_v55 = vld [vmem:[#allocation11 + $0x50] sm:$0xff]  ;;  %v493_v60 = vld [vmem:[#allocation11 + $0x60] sm:$0xff]  ;;  %v522_v34 = vld [vmem:[#allocation11 + $0x148] sm:$0xff] }
  0x74   :  { %690 = vmatpush1.bf16.msra.mxu1 %v689_v44  ;;  %v486_v44 = vld [vmem:[#allocation11 + $0x28] sm:$0xff]  ;;  %732 = vmatprep.subr.bf16.mxu0 %v731_v42  ;;  %v741_v58 = vpack.c.bf16 %v491_v55, %v489_v54  ;;  %v495_v61 = vld [vmem:[#allocation11 + $0x70] sm:$0xff]  ;;  %v497_v2 = vld [vmem:[#allocation11 + $0x80] sm:$0xff] }
  0x75   :  { %692 = vmatprep.subr.bf16.mxu1 %v691_v45  ;;  %v488_v45 = vld [vmem:[#allocation11 + $0x38] sm:$0xff]  ;;  %734 = vmatpush1.bf16.msra.mxu0 %v733_v46  ;;  %v745_v0 = vpack.c.bf16 %v495_v61, %v493_v60  ;;  %v499_v3 = vld [vmem:[#allocation11 + $0x90] sm:$0xff]  ;;  %v501_v8 = vld [vmem:[#allocation11 + $0xa0] sm:$0xff] }
  0x76   :  { %v735_v47 = vpack.c.bf16 %v488_v45, %v486_v44  ;;  %v749_v6 = vpack.c.bf16 %v499_v3, %v497_v2  ;;  %v503_v9 = vld [vmem:[#allocation11 + $0xb0] sm:$0xff]  ;;  %v505_v14 = vld [vmem:[#allocation11 + $0xc0] sm:$0xff]  ;;  %v526_v40 = vld [vmem:[#allocation11 + $0x168] sm:$0xff] }
  0x77   :  { %v753_v12 = vpack.c.bf16 %v503_v9, %v501_v8  ;;  %v507_v15 = vld [vmem:[#allocation11 + $0xd0] sm:$0xff]  ;;  %v509_v20 = vld [vmem:[#allocation11 + $0xe0] sm:$0xff]  ;;  %v528_v41 = vld [vmem:[#allocation11 + $0x178] sm:$0xff] }
  0x78   :  { %694 = vmatpush1.bf16.msra.mxu1 %v693_v50  ;;  %v490_v50 = vld [vmem:[#allocation11 + $0x48] sm:$0xff]  ;;  %736 = vmatprep.subr.bf16.mxu0 %v735_v47  ;;  %v757_v18 = vpack.c.bf16 %v507_v15, %v505_v14  ;;  %v511_v21 = vld [vmem:[#allocation11 + $0xf0] sm:$0xff]  ;;  %v775_v43 = vpack.c.bf16 %v528_v41, %v526_v40  ;;  %v525_v44 = vld [vmem:[#allocation11 + $0x160] sm:$0xff] }
  0x79   :  { %696 = vmatprep.subr.bf16.mxu1 %v695_v51  ;;  %v492_v51 = vld [vmem:[#allocation11 + $0x58] sm:$0xff]  ;;  %738 = vmatpush1.bf16.msra.mxu0 %v737_v52  ;;  %v761_v24 = vpack.c.bf16 %v511_v21, %v509_v20  ;;  %v515_v27 = vld [vmem:[#allocation11 + $0x110] sm:$0xff]  ;;  %v530_v46 = vld [vmem:[#allocation11 + $0x188] sm:$0xff] }
  0x7a   :  { %v739_v53 = vpack.c.bf16 %v492_v51, %v490_v50  ;;  %v519_v33 = vld [vmem:[#allocation11 + $0x130] sm:$0xff]  ;;  %v532_v47 = vld [vmem:[#allocation11 + $0x198] sm:$0xff]  ;;  %v529_v50 = vld [vmem:[#allocation11 + $0x180] sm:$0xff] }
  0x7b   :  { %v523_v39 = vld [vmem:[#allocation11 + $0x150] sm:$0xff]  ;;  %v779_v49 = vpack.c.bf16 %v532_v47, %v530_v46  ;;  %v534_v52 = vld [vmem:[#allocation11 + $0x1a8] sm:$0xff] }
  0x7c   :  { %698 = vmatpush1.bf16.msra.mxu1 %v697_v56  ;;  %v494_v56 = vld [vmem:[#allocation11 + $0x68] sm:$0xff]  ;;  %740 = vmatprep.subr.bf16.mxu0 %v739_v53  ;;  %v527_v45 = vld [vmem:[#allocation11 + $0x170] sm:$0xff]  ;;  %v536_v53 = vld [vmem:[#allocation11 + $0x1b8] sm:$0xff] }
  0x7d   :  { %700 = vmatprep.subr.bf16.mxu1 %v699_v57  ;;  %v496_v57 = vld [vmem:[#allocation11 + $0x78] sm:$0xff]  ;;  %742 = vmatpush1.bf16.msra.mxu0 %v741_v58  ;;  %v777_v48 = vpack.c.bf16 %v527_v45, %v525_v44  ;;  %v531_v51 = vld [vmem:[#allocation11 + $0x190] sm:$0xff]  ;;  %v783_v55 = vpack.c.bf16 %v536_v53, %v534_v52  ;;  %v538_v58 = vld [vmem:[#allocation11 + $0x1c8] sm:$0xff] }
  0x7e   :  { %v743_v59 = vpack.c.bf16 %v496_v57, %v494_v56  ;;  %v781_v54 = vpack.c.bf16 %v531_v51, %v529_v50  ;;  %v533_v56 = vld [vmem:[#allocation11 + $0x1a0] sm:$0xff]  ;;  %v535_v57 = vld [vmem:[#allocation11 + $0x1b0] sm:$0xff] }
  0x7f   :  { %v785_v60 = vpack.c.bf16 %v535_v57, %v533_v56  ;;  %v94_v2 = vld [vmem:[#allocation6] sm:$0x77]  ;;  %v537_v53 = vld [vmem:[#allocation11 + $0x1c0] sm:$0xff]  ;;  %v542_v56 = vld [vmem:[#allocation11 + $0x1e8] sm:$0xff] }
  0x80   :  { %702 = vmatpush1.bf16.msra.mxu1 %v701_v62  ;;  %v498_v62 = vld [vmem:[#allocation11 + $0x88] sm:$0xff]  ;;  %744 = vmatprep.subr.bf16.mxu0 %v743_v59  ;;  %v540_v59 = vld [vmem:[#allocation11 + $0x1d8] sm:$0xff] }
  0x81   :  { %704 = vmatprep.subr.bf16.mxu1 %v703_v63  ;;  %v500_v63 = vld [vmem:[#allocation11 + $0x98] sm:$0xff]  ;;  %746 = vmatpush1.bf16.msra.mxu0 %v745_v0  ;;  %v787_v61 = vpack.c.bf16 %v540_v59, %v538_v58  ;;  %v541_v59 = vld [vmem:[#allocation11 + $0x1e0] sm:$0xff] }
  0x82   :  { %v747_v1 = vpack.c.bf16 %v500_v63, %v498_v62  ;;  %v103_v62 = vlaneseq  ;;  %v544_v57 = vld [vmem:[#allocation11 + $0x1f8] sm:$0xff] }
  0x83   :  { %v791_v58 = vpack.c.bf16 %v544_v57, %v542_v56 }
  0x84   :  { %706 = vmatpush1.bf16.msra.mxu1 %v705_v4  ;;  %v502_v4 = vld [vmem:[#allocation11 + $0xa8] sm:$0xff]  ;;  %748 = vmatprep.subr.bf16.mxu0 %v747_v1  ;;  %v104_v63 = vshrl.u32 %v103_v62, 7  ;;  %v97_v62 = vld [vmem:[#allocation8 + $0x1] ss:$4 sm:$0x3] }
  0x85   :  { %708 = vmatprep.subr.bf16.mxu1 %v707_v5  ;;  %v504_v5 = vld [vmem:[#allocation11 + $0xb8] sm:$0xff]  ;;  %750 = vmatpush1.bf16.msra.mxu0 %v749_v6 }
  0x86   :  { %v751_v7 = vpack.c.bf16 %v504_v5, %v502_v4  ;;  %v227_v0 = vsub.s32 4, %v104_v63  ;;  %v274_v1 = vsub.s32 5, %v104_v63  ;;  %v1086_v3 = vsub.s32 0, %v104_v63 }
  0x87   :  { %v1088_v4 = vsub.s32 1, %v104_v63 }
  0x88   :  { %710 = vmatpush1.bf16.msra.mxu1 %v709_v10  ;;  %v506_v10 = vld [vmem:[#allocation11 + $0xc8] sm:$0xff]  ;;  %752 = vmatprep.subr.bf16.mxu0 %v751_v7  ;;  %v228_v6 = vrot.slane %v94_v2, %v227_v0  ;;  %v275_v7 = vrot.slane %v94_v2, %v274_v1  ;;  %v224_v8 = vrot.slane %v94_v2, %v1086_v3 }
  0x89   :  { %712 = vmatprep.subr.bf16.mxu1 %v711_v11  ;;  %v508_v11 = vld [vmem:[#allocation11 + $0xd8] sm:$0xff]  ;;  %754 = vmatpush1.bf16.msra.mxu0 %v753_v12  ;;  %v271_v9 = vrot.slane %v94_v2, %v1088_v4  ;;  %v385_v63 = vrot.slane %v97_v62, %v1086_v3  ;;  %v389_v0 = vrot.slane %v97_v62, %v1088_v4 }
  0x8a   :  { %v755_v13 = vpack.c.bf16 %v508_v11, %v506_v10  ;;  %v238_v10 = vrot.slane %v228_v6, %v1086_v3  ;;  %v285_v11 = vrot.slane %v275_v7, %v1088_v4  ;;  %v234_v14 = vrot.slane %v224_v8, %v1086_v3 }
  0x8b   :  { %v281_v15 = vrot.slane %v271_v9, %v1088_v4 }
  0x8c   :  { %714 = vmatpush1.bf16.msra.mxu1 %v713_v16  ;;  %v510_v16 = vld [vmem:[#allocation11 + $0xe8] sm:$0xff]  ;;  %756 = vmatprep.subr.bf16.mxu0 %v755_v13  ;;  %v95_v13 = vld [vmem:[#allocation8] ss:$4 sm:$0x3] }
  0x8d   :  { %716 = vmatprep.subr.bf16.mxu1 %v715_v17  ;;  %v512_v17 = vld [vmem:[#allocation11 + $0xf8] sm:$0xff]  ;;  %758 = vmatpush1.bf16.msra.mxu0 %v757_v18  ;;  %v197_v18 = vld [vmem:[%s1133_s4] ss:$4 sm:$0x3]  ;;  %v110_v20 = vrot.slane %v95_v13, %v1088_v4 }
  0x8e   :  { %v759_v19 = vpack.c.bf16 %v512_v17, %v510_v16 }
  0x90   :  { %718 = vmatpush1.bf16.msra.mxu1 %v717_v22  ;;  %v514_v22 = vld [vmem:[#allocation11 + $0x108] sm:$0xff]  ;;  %760 = vmatprep.subr.bf16.mxu0 %v759_v19  ;;  %v106_v19 = vrot.slane %v95_v13, %v1086_v3 }
  0x91   :  { %720 = vmatprep.subr.bf16.mxu1 %v719_v23  ;;  %v516_v23 = vld [vmem:[#allocation11 + $0x118] sm:$0xff]  ;;  %762 = vmatpush1.bf16.msra.mxu0 %v761_v24  ;;  %v665_v24 = vld [vmem:[%s1133_s4 + $0x1] ss:$4 sm:$0x3] }
  0x92   :  { %v763_v25 = vpack.c.bf16 %v516_v23, %v514_v22  ;;  %v202_v23 = vrot.slane %v197_v18, %v1086_v3 }
  0x94   :  { %722 = vmatpush1.bf16.msra.mxu1 %v721_v26  ;;  %v513_v26 = vld [vmem:[#allocation11 + $0x100] sm:$0xff]  ;;  %764 = vmatprep.subr.bf16.mxu0 %v763_v25 }
  0x95   :  { %724 = vmatprep.subr.bf16.mxu1 %v723_v29  ;;  %v520_v29 = vld [vmem:[#allocation11 + $0x138] sm:$0xff]  ;;  %v765_v30 = vpack.c.bf16 %v515_v27, %v513_v26  ;;  %v206_v27 = vrot.slane %v197_v18, %v1088_v4 }
  0x96   :  { %v767_v31 = vpack.c.bf16 %v520_v29, %v518_v28 }
  0x97   :  { %766 = vmatpush1.bf16.msra.mxu0 %v765_v30  ;;  %v666_v30 = vld [vmem:[%s1133_s4 + $0x2] ss:$4 sm:$0x3]  ;;  %s958_s4 = smov [#allocation12]  }
  0x98   :  { %726 = vmatpush1.bf16.msra.mxu1 %v725_v32  ;;  %v517_v32 = vld [vmem:[#allocation11 + $0x120] sm:$0xff]  ;;  %768 = vmatprep.subr.bf16.mxu0 %v767_v31  ;;  %v302_v40 = vrot.slane %v666_v30, %v1088_v4  ;;  %v298_v46 = vrot.slane %v666_v30, %v1086_v3  ;;  %s651_s26 = sshll.u32 %s958_s4, 4  ;;  %s652_s26 = int_to_ptr.vmem [resolvable:$true] %s651_s26 }
  0x99   :  { %728 = vmatprep.subr.bf16.mxu1 %v727_v35  ;;  %v524_v35 = vld [vmem:[#allocation11 + $0x158] sm:$0xff]  ;;  %v769_v36 = vpack.c.bf16 %v519_v33, %v517_v32  ;;  %v255_v32 = vrot.slane %v665_v24, %v1088_v4  ;;  %s918_s28 = scalar_lea.vmem %s652_s26, 768  ;;  %p923_p13 = scmp.lt.s32.totalorder %s652_s26, %s652_s26 }
  0x9a   :  { %v771_v37 = vpack.c.bf16 %v524_v35, %v522_v34  ;;  %p919_p12 = scmp.ne.s32.totalorder %s652_s26, %s918_s28  ;;  %p924_p0 = scmp.lt.s32.totalorder %s918_s28, %s918_s28 }
  0x9b   :  { %770 = vmatpush1.bf16.msra.mxu0 %v769_v36  ;;  %v251_v36 = vrot.slane %v665_v24, %v1086_v3 }
  0x9c   :  { %730 = vmatpush1.bf16.msra.mxu1 %v729_v38  ;;  %v521_v38 = vld [vmem:[#allocation11 + $0x140] sm:$0xff]  ;;  %772 = vmatprep.subr.bf16.mxu0 %v771_v37  ;;  %p925_p1 = por %p924_p0, %p923_p13 }
  0x9d   :  { %v773_v42 = vpack.c.bf16 %v523_v39, %v521_v38 }
  0x9e   :  { %p926_p2 = pnand %p925_p1, %p919_p12 }
  0x9f   :  { %774 = vmatpush1.bf16.msra.mxu0 %v773_v42 }
  0xa0   :  { %776 = vmatprep.subr.bf16.mxu0 %v775_v43 }
  0xa3   :  { %778 = vmatpush1.bf16.msra.mxu0 %v777_v48 }
  0xa4   :  { %780 = vmatprep.subr.bf16.mxu0 %v779_v49 }
  0xa7   :  { %782 = vmatpush1.bf16.msra.mxu0 %v781_v54  ;;  %v539_v54 = vld [vmem:[#allocation11 + $0x1d0] sm:$0xff] }
  0xa8   :  { %784 = vmatprep.subr.bf16.mxu0 %v783_v55  ;;  %v789_v55 = vpack.c.bf16 %v539_v54, %v537_v53 }
  0xab   :  { %786 = vmatpush1.bf16.msra.mxu0 %v785_v60  ;;  %v543_v60 = vld [vmem:[#allocation11 + $0x1f0] sm:$0xff] }
  0xac   :  { %788 = vmatprep.subr.bf16.mxu0 %v787_v61  ;;  %v793_v61 = vpack.c.bf16 %v543_v60, %v541_v59 }
  0xaf   :  { %790 = vmatpush1.bf16.msra.mxu0 %v789_v55 }
  0xb0   :  { %792 = vmatprep.subr.bf16.mxu0 %v791_v58 }
  0xb3   :  { %794 = vmatpush1.bf16.msra.mxu0 %v793_v61 }
  0xdb   :  { %v218_v5 = vpop.permute.xlu0 %217 }
  0xdc   :  { %v240_v16 = vmul.f32 %v238_v10, %v218_v5  ;;  %v239_v21 = vmul.f32 %v234_v14, %v218_v5 }
  0xe0   :  { %v266_v12 = vpop.permute.xlu0 %265 }
  0xe1   :  { %v287_v17 = vmul.f32 %v285_v11, %v266_v12  ;;  %v286_v22 = vmul.f32 %v281_v15, %v266_v12 }
  0xe3   :  { %v289_v25 = vadd.f32 %v287_v17, %v240_v16  ;;  %v288_v33 = vadd.f32 %v286_v22, %v239_v21 }
 0x130   :  { %v190_v26 = vpop.f32.mrb[0].mxu0 }
 0x131   :  { %v191_v28 = vadd.f32 %v190_v26, %v106_v19  ;;  %v192_v29 = vpop.f32.mrb[1].mxu0 }
 0x132   :  { %v193_v31 = vadd.f32 %v192_v29, %v110_v20 }
 0x133   :  { %v243_v34 = vadd.f32 %v239_v21, %v191_v28  ;;  %v209_v35 = vadd.f32 %v202_v23, %v191_v28  ;;  %v290_v43 = vadd.f32 %v288_v33, %v191_v28  ;;  %v99_v21 = vld [vmem:[#allocation8 + $0x2] ss:$4 sm:$0x3] }
 0x134   :  { %v244_v37 = vadd.f32 %v240_v16, %v193_v31  ;;  %v291_v38 = vadd.f32 %v289_v25, %v193_v31  ;;  %v210_v39 = vadd.f32 %v206_v27, %v193_v31  ;;  %v549_v22 = vrot.slane %v99_v21, %v1086_v3 }
 0x135   :  { %v211_v44 = vmax.f32 %v209_v35, 0.0  ;;  %v258_v45 = vadd.f32 %v251_v36, %v243_v34  ;;  %v305_v50 = vadd.f32 %v298_v46, %v290_v43  ;;  %v553_v23 = vrot.slane %v99_v21, %v1088_v4 }
 0x136   :  { %v212_v41 = vmax.f32 %v210_v39, 0.0  ;;  %v259_v42 = vadd.f32 %v255_v32, %v244_v37  ;;  %v306_v48 = vadd.f32 %v302_v40, %v291_v38 }
 0x137   :  { %v260_v49 = vmax.f32 %v258_v45, 0.0  ;;  %v307_v52 = vmax.f32 %v305_v50, 0.0 }
 0x138   :  { %456 = vmatprep.mubr.f32.mxu1 %v212_v41  ;;  %v261_v47 = vmax.f32 %v259_v42, 0.0  ;;  %v308_v51 = vmax.f32 %v306_v48, 0.0 }
 0x139   :  { %457 = vmatmul.mubr.f32.vlgmr.msra.gmra.mrb[0].mxu1 %v211_v44 }
 0x13a   :  { %462 = vmatprep.mubr.f32.mxu1 %v261_v47 }
 0x13d   :  { %463 = vmatmul.mubr.f32.gmra.mrb[2].mxu1 %v260_v49 }
 0x13e   :  { %468 = vmatprep.mubr.f32.mxu1 %v308_v51 }
 0x141   :  { %469 = vmatmul.mubr.f32.gmra.mrb[4].mxu1 %v307_v52 }
 0x20c   :  { %v458_v1 = vpop.f32.mrb[0].mxu1 }
 0x20d   :  { %v459_v2 = vadd.f32 %v458_v1, %v385_v63  ;;  %v460_v5 = vpop.f32.mrb[1].mxu1 }
 0x20e   :  { %v461_v6 = vadd.f32 %v460_v5, %v389_v0 }
 0x20f   :  { %v475_v9 = vmax.f32 %v459_v2, 0.0 }
 0x210   :  { %v476_v7 = vmax.f32 %v461_v6, 0.0  ;;  %v464_v8 = vpop.f32.mrb[2].mxu1 }
 0x211   :  { %v465_v10 = vadd.f32 %v464_v8, %v385_v63  ;;  %v466_v11 = vpop.f32.mrb[3].mxu1 }
 0x212   :  { %v467_v12 = vadd.f32 %v466_v11, %v389_v0  ;;  %620 = vmatprep.mubr.f32.mxu0 %v476_v7 }
 0x213   :  { %621 = vmatmul.mubr.f32.vlgmr.msra.gmra.mrb[2].mxu0 %v475_v9  ;;  %v477_v15 = vmax.f32 %v465_v10, 0.0 }
 0x214   :  { %v478_v13 = vmax.f32 %v467_v12, 0.0  ;;  %v470_v14 = vpop.f32.mrb[4].mxu1 }
 0x215   :  { %v471_v16 = vadd.f32 %v470_v14, %v385_v63  ;;  %v472_v17 = vpop.f32.mrb[5].mxu1 }
 0x216   :  { %v473_v18 = vadd.f32 %v472_v17, %v389_v0  ;;  %626 = vmatprep.mubr.f32.mxu0 %v478_v13 }
 0x217   :  { %627 = vmatmul.mubr.f32.gmra.mrb[4].mxu0 %v477_v15  ;;  %v479_v20 = vmax.f32 %v471_v16, 0.0 }
 0x218   :  { %v480_v19 = vmax.f32 %v473_v18, 0.0 }
 0x21a   :  { %632 = vmatprep.mubr.f32.mxu0 %v480_v19 }
 0x21b   :  { %633 = vmatmul.mubr.f32.gmra.mrb[6].mxu0 %v479_v20 }
 0x2e6   :  { %v622_v24 = vpop.f32.mrb[2].mxu0 }
 0x2e7   :  { %v623_v25 = vadd.f32 %v622_v24, %v549_v22  ;;  %v624_v26 = vpop.f32.mrb[3].mxu0 }
 0x2e8   :  { %v625_v27 = vadd.f32 %v624_v26, %v553_v23 }
 0x2e9   :  { %639 = vst [vmem:[#allocation12] sm:$0xff] %v623_v25 }
 0x2ea   :  { %640 = vst [vmem:[#allocation12 + $0x8] sm:$0xff] %v625_v27  ;;  %v628_v28 = vpop.f32.mrb[4].mxu0 }
 0x2eb   :  { %v629_v29 = vadd.f32 %v628_v28, %v549_v22  ;;  %v630_v30 = vpop.f32.mrb[5].mxu0 }
 0x2ec   :  { %v631_v31 = vadd.f32 %v630_v30, %v553_v23 }
 0x2ed   :  { %641 = vst [vmem:[#allocation12 + $0x10] sm:$0xff] %v629_v29 }
 0x2ee   :  { %642 = vst [vmem:[#allocation12 + $0x18] sm:$0xff] %v631_v31  ;;  %v634_v32 = vpop.f32.mrb[6].mxu0 }
 0x2ef   :  { %v635_v33 = vadd.f32 %v634_v32, %v549_v22  ;;  %v636_v34 = vpop.f32.mrb[7].mxu0 }
 0x2f0   :  { %v637_v3 = vadd.f32 %v636_v34, %v553_v23 }
 0x2f1   :  { %643 = vst [vmem:[#allocation12 + $0x20] sm:$0xff] %v635_v33 }
 0x2f2   :  { %644 = vst [vmem:[#allocation12 + $0x28] sm:$0xff] %v637_v3 }
 0x2f3   :  { %929 = shalt.err (!%p926_p2)
}
 0x2f4   :  { %s930_s9 = scalar_lea.hbm %s1137_s8, 768 }
 0x2f5   :  { %p931_p3 = scmp.ne.s32.totalorder %s1137_s8, %s930_s9  ;;  %p934_p4 = scmp.lt.u32.totalorder %s930_s9, %s1137_s8 }
 0x2f7   :  { %p936_p5 = pnand %p934_p4, %p931_p3 }
 0x2f9   :  { %939 = shalt.err (!%p936_p5)
}
 0x2fa   :  { %654 = dma.vmem_to_hbm [thread:$0]  %s652_s26, 768, %s1137_s8, [#allocation5]  }
 0x2fb   :  { %946 = dma.done.wait [#allocation5], 768  }
 0x2fc   :  { %947 = vsyncadd [#allocation5], 4294966528 }
 0x2fd   :  { %658 = vsyncpa [#allocation4], 1 }
 0x2fe   :  { %659 = vsyncpa [#allocation7], 1 }
 0x2ff   :  { %660 = vsyncpa [#allocation10], 1 }
 0x300   :  { %661 = vsyncpa [#allocation5], 1 }

</bundles_post_ra>
